<compile_context>
chip_gen: v7x
topology: tpu7x:2x2x1
jax: 0.10.0
libtpu: 0.0.40
codegen_flags: <defaults>
</compile_context>

<pallas_src>
import functools

import jax
import jax.numpy as jnp
from jax.experimental import pallas as pl
from jax.experimental.pallas import tpu as pltpu


def _conv_bn_lrelu_kernel(x_ref, w_ref, scale_ref, bias_ref, o_ref, acc_ref,
                          *, K, tile_h, nb, w_cout, n_h_tiles):
    """One (batch-block, H-tile) step of the fused conv + BN + LeakyReLU.

    x_ref:     (nb, Hp, row_len)     bf16 padded image rows (resident per b)
    w_ref:     (K, row_len, w_cout)  bf16 block-Toeplitz row weights (resident)
    scale_ref: (1, w_cout)           f32 folded BN scale (flat output layout)
    bias_ref:  (1, w_cout)           f32 folded BN bias
    o_ref:     (nb, tile_h, w_cout)  bf16 output block
    acc_ref:   (nb*tile_h, w_cout)   f32 scratch accumulator
    """
    if n_h_tiles == 1:
        row0 = 0  # static slices when the image is not tiled along H
    else:
        row0 = pl.multiple_of(pl.program_id(1) * tile_h, tile_h)

    m = nb * tile_h
    row_len = x_ref.shape[-1]

    # One MXU matmul per vertical tap kh, all chained into a single f32
    # accumulator (free in-MRB accumulation on v7x, plain adds elsewhere).
    for kh in range(K):
        x_slab = x_ref[:, pl.ds(row0 + kh, tile_h), :]      # (nb, tile_h, row_len)
        x2d = x_slab.reshape(m, row_len)
        p = jnp.dot(x2d, w_ref[kh], preferred_element_type=jnp.float32)
        if kh == 0:
            acc_ref[...] = p
        else:
            acc_ref[...] += p

    # Fused BatchNorm (folded scale/bias) + LeakyReLU(0.1) epilogue, in f32.
    y = acc_ref[...] * scale_ref[...] + bias_ref[...]
    y = jnp.maximum(y, 0.1 * y)
    o_ref[...] = y.reshape(nb, tile_h, w_cout).astype(o_ref.dtype)


def _pack_row_weights(w_hwio, W, row_len):
    """Pack (K,K,Cin,Cout) conv weights into K block-Toeplitz row matrices.

    B[kh, (w+kw)*Cin + ci, w*Cout + co] = w_hwio[kh, kw, ci, co]
    so that  out_row[h] = sum_kh  x_pad_row[h+kh] (row_len)  @  B[kh].
    Rows beyond Wp*Cin (lane padding) stay zero.
    """
    K, _, Cin, Cout = w_hwio.shape
    eye_w = jnp.eye(W, dtype=jnp.float32)
    taps = []
    for kh in range(K):
        b = jnp.zeros((row_len, W * Cout), jnp.float32)
        for kw in range(K):
            blk = jnp.kron(eye_w, w_hwio[kh, kw].astype(jnp.float32))
            b = b.at[kw * Cin:kw * Cin + W * Cin, :].add(blk)
        taps.append(b)
    return jnp.stack(taps, axis=0)             # (K, row_len, W*Cout)


def _choose_blocking(N, H, *, target_m=128, max_tile_h=256):
    """Pick (tile_h, nb): rows per matmul and batch images stacked per step."""
    if H <= max_tile_h:
        tile_h = H
    else:
        tile_h = None
        t = 8
        while t <= max_tile_h:
            if H % t == 0:
                tile_h = t
            t += 8
        if tile_h is None:
            tile_h = H                          # fallback: whole (odd) height
    n_h_tiles = H // tile_h

    # Stack batch images along M to approach target_m MXU rows ...
    nb = max(1, min(N, target_m // max(tile_h, 1)))
    if nb > 1 and tile_h % 16 != 0:
        nb = 1                                  # keep bf16 (nb,tile_h)->m reshape trivial
    while nb > 1 and N % nb != 0:
        nb -= 1
    # ... but keep >= 2 grid steps when possible so v7x's 2 TCs both get work.
    if nb > 1 and (N // nb) * n_h_tiles < 2:
        nb = max(1, nb // 2)
        while nb > 1 and N % nb != 0:
            nb -= 1
    return tile_h, nb


def basic_conv(x_nchw, weight_oihw, gamma, beta, running_mean, running_var,
               *, kernel_size, stride=1, eps=1e-5, compute_dtype=jnp.bfloat16):
    """Forward pass equivalent to BasicConv.forward (BatchNorm in eval mode)."""
    # TODO(synk): stride > 1 not implemented (the module defaults to stride=1).
    assert stride == 1, "only stride=1 is implemented"
    assert kernel_size % 2 == 1, "same-size output requires an odd kernel_size"

    N, Cin, H, W = x_nchw.shape
    Cout = weight_oihw.shape[0]
    K = kernel_size
    pad = K // 2
    Hp, Wp = H + 2 * pad, W + 2 * pad
    w_cout = W * Cout
    # TODO(synk): for large W, add a width-tile grid axis so the block-Toeplitz
    # weight pack (O(W^2)) and its MXU waste stay bounded (v7x has 64 MiB VMEM).
    row_len = ((Wp * Cin + 127) // 128) * 128   # lane-align the flattened rows

    tile_h, nb = _choose_blocking(N, H)
    assert H % tile_h == 0 and N % nb == 0
    n_h_tiles = H // tile_h

    # ---- Fold BN into per-channel scale/bias (inference semantics), tiled to
    # the flattened (W*Cout) output layout.  Kept f32 for the epilogue.
    scale = gamma.astype(jnp.float32) / jnp.sqrt(
        running_var.astype(jnp.float32) + eps)
    bias = beta.astype(jnp.float32) - running_mean.astype(jnp.float32) * scale
    scale_flat = jnp.tile(scale, W).reshape(1, w_cout)
    bias_flat = jnp.tile(bias, W).reshape(1, w_cout)

    # ---- Input: NCHW -> NHWC (bf16), spatial zero pad, flatten rows to Wp*Cin
    # and zero-pad each row up to a multiple of 128 lanes.
    x_nhwc = jnp.transpose(x_nchw, (0, 2, 3, 1)).astype(compute_dtype)
    x_pad = jnp.pad(x_nhwc, ((0, 0), (pad, pad), (pad, pad), (0, 0)))
    x_flat = x_pad.reshape(N, Hp, Wp * Cin)
    x_flat = jnp.pad(x_flat, ((0, 0), (0, 0), (0, row_len - Wp * Cin)))

    # ---- Weights: OIHW -> HWIO -> block-Toeplitz row matrices, bf16.
    w_hwio = jnp.transpose(weight_oihw, (2, 3, 1, 0))
    w_pack = _pack_row_weights(w_hwio, W, row_len).astype(compute_dtype)

    kernel = functools.partial(_conv_bn_lrelu_kernel, K=K, tile_h=tile_h,
                               nb=nb, w_cout=w_cout, n_h_tiles=n_h_tiles)

    out_flat = pl.pallas_call(
        kernel,
        out_shape=jax.ShapeDtypeStruct((N, H, w_cout), compute_dtype),
        grid_spec=pltpu.PrefetchScalarGridSpec(
            num_scalar_prefetch=0,
            grid=(N // nb, n_h_tiles),
            in_specs=[
                # Whole padded image(s) per batch block; constant along the H
                # axis so the block stays resident across H-tiles while the
                # auto-pipeline prefetches the next batch block.
                pl.BlockSpec((nb, Hp, row_len), lambda b, h: (b, 0, 0)),
                # Grid-invariant residents (constant index_map -> loaded once).
                pl.BlockSpec((K, row_len, w_cout), lambda b, h: (0, 0, 0)),
                pl.BlockSpec((1, w_cout), lambda b, h: (0, 0)),
                pl.BlockSpec((1, w_cout), lambda b, h: (0, 0)),
            ],
            out_specs=pl.BlockSpec((nb, tile_h, w_cout),
                                   lambda b, h: (b, h, 0)),
            scratch_shapes=[pltpu.VMEM((nb * tile_h, w_cout), jnp.float32)],
        ),
        compiler_params=pltpu.CompilerParams(
            dimension_semantics=("parallel", "parallel"),
            vmem_limit_bytes=32 * 1024 * 1024,
        ),
    )(x_flat, w_pack, scale_flat, bias_flat)

    # (N, H, W*Cout) -> NCHW (the transpose is the NCHW interface cost; fold
    # into the consumer if the surrounding network runs channels-last).
    out_nhwc = out_flat.reshape(N, H, W, Cout)
    return jnp.transpose(out_nhwc, (0, 3, 1, 2))


def _reference(x_nchw, weight_oihw, gamma, beta, running_mean, running_var,
               *, kernel_size, eps=1e-5):
    """Pure-JAX reference (inputs quantized to bf16, like the kernel's feed)."""
    pad = kernel_size // 2
    xq = x_nchw.astype(jnp.bfloat16).astype(jnp.float32)
    wq = weight_oihw.astype(jnp.bfloat16).astype(jnp.float32)
    y = jax.lax.conv_general_dilated(
        xq, wq, window_strides=(1, 1), padding=[(pad, pad), (pad, pad)],
        dimension_numbers=("NCHW", "OIHW", "NCHW"),
        precision=jax.lax.Precision.HIGHEST)
    scale = (gamma / jnp.sqrt(running_var + eps)).reshape(1, -1, 1, 1)
    bias = beta.reshape(1, -1, 1, 1) - running_mean.reshape(1, -1, 1, 1) * scale
    y = y * scale + bias
    return jnp.where(y > 0, y, 0.1 * y)


if __name__ == "__main__":
    key = jax.random.PRNGKey(0)
    k_x, k_w, k_g, k_b, k_m, k_v = jax.random.split(key, 6)

    N, Cin, H, W = 2, 4, 16, 16
    Cout, K = 8, 3

    x = jax.random.normal(k_x, (N, Cin, H, W), dtype=jnp.float32)
    weight = jax.random.normal(k_w, (Cout, Cin, K, K), dtype=jnp.float32) * 0.1
    gamma = 1.0 + 0.1 * jax.random.normal(k_g, (Cout,), dtype=jnp.float32)
    beta = 0.1 * jax.random.normal(k_b, (Cout,), dtype=jnp.float32)
    running_mean = 0.1 * jax.random.normal(k_m, (Cout,), dtype=jnp.float32)
    running_var = jnp.abs(
        1.0 + 0.1 * jax.random.normal(k_v, (Cout,), dtype=jnp.float32))

    out = basic_conv(x, weight, gamma, beta, running_mean, running_var,
                     kernel_size=K, stride=1)
    out = jax.block_until_ready(out)

    ref = _reference(x, weight, gamma, beta, running_mean, running_var,
                     kernel_size=K)
    assert out.shape == (N, Cout, H, W)
    out_f32 = out.astype(jnp.float32)
    max_err = float(jnp.max(jnp.abs(out_f32 - ref)))
    # bf16 output store dominates the error budget.
    assert jnp.allclose(out_f32, ref, atol=3e-2, rtol=3e-2), \
        f"max abs err {max_err}"

    print("KERNEL_OK")
</pallas_src>

<mosaic_0001>
module attributes {stable_mosaic.version = 11 : i64} {
  func.func @_conv_bn_lrelu_kernel(%arg0: i32, %arg1: i32, %arg2: memref<1x18x128xbf16, #tpu.memory_space<vmem>>, %arg3: memref<3x128x128xbf16, #tpu.memory_space<vmem>>, %arg4: memref<1x128xf32, #tpu.memory_space<vmem>>, %arg5: memref<1x128xf32, #tpu.memory_space<vmem>>, %arg6: memref<1x16x128xbf16, #tpu.memory_space<vmem>>, %arg7: memref<16x128xf32, #tpu.memory_space<vmem>>) attributes {dimension_semantics = [#tpu.dimension_semantics<parallel>, #tpu.dimension_semantics<parallel>], iteration_bounds = array<i64: 2, 1>, scalar_prefetch = 0 : i64, scratch_operands = 1 : i64, tpu.core_type = #tpu.core_type<tc>, window_params = [{transform_indices = @transform_0, window_bounds = array<i64: 1, 18, 128>}, {pipeline_mode = #tpu.pipeline_mode<synchronous>, transform_indices = @transform_1, window_bounds = array<i64: 3, 128, 128>}, {pipeline_mode = #tpu.pipeline_mode<synchronous>, transform_indices = @transform_2, window_bounds = array<i64: 1, 128>}, {pipeline_mode = #tpu.pipeline_mode<synchronous>, transform_indices = @transform_3, window_bounds = array<i64: 1, 128>}, {transform_indices = @transform_4, window_bounds = array<i64: 1, 16, 128>}]} {
    %c0 = arith.constant 0 : index
    %c0_0 = arith.constant 0 : index
    %c0_1 = arith.constant 0 : index
    %0 = vector.load %arg2[%c0, %c0_0, %c0_1] : memref<1x18x128xbf16, #tpu.memory_space<vmem>>, vector<1x16x128xbf16>
    %1 = vector.shape_cast %0 : vector<1x16x128xbf16> to vector<16x128xbf16>
    %c0_2 = arith.constant 0 : index
    %c0_3 = arith.constant 0 : index
    %c0_4 = arith.constant 0 : index
    %2 = vector.load %arg3[%c0_2, %c0_3, %c0_4] : memref<3x128x128xbf16, #tpu.memory_space<vmem>>, vector<1x128x128xbf16>
    %3 = vector.shape_cast %2 : vector<1x128x128xbf16> to vector<128x128xbf16>
    %cst = arith.constant dense<0.000000e+00> : vector<16x128xf32>
    %4 = tpu.matmul %1, %3, %cst {dimension_numbers = #tpu.dot_dimension_numbers<[1], [0], [0], [1], [0, 0, 1, 1], [], []>} : vector<16x128xbf16>, vector<128x128xbf16>, vector<16x128xf32> -> vector<16x128xf32>
    %c0_5 = arith.constant 0 : index
    %c0_6 = arith.constant 0 : index
    %5 = vector.load %arg7[%c0_5, %c0_6] : memref<16x128xf32, #tpu.memory_space<vmem>>, vector<16x128xf32>
    tpu.vector_store %arg7[%c0_5, %c0_6], %4 {strides = array<i32>} : memref<16x128xf32, #tpu.memory_space<vmem>>, vector<16x128xf32>,
    %c0_7 = arith.constant 0 : index
    %c1 = arith.constant 1 : index
    %c0_8 = arith.constant 0 : index
    %6 = vector.load %arg2[%c0_7, %c1, %c0_8] : memref<1x18x128xbf16, #tpu.memory_space<vmem>>, vector<1x16x128xbf16>
    %7 = vector.shape_cast %6 : vector<1x16x128xbf16> to vector<16x128xbf16>
    %c1_9 = arith.constant 1 : index
    %c0_10 = arith.constant 0 : index
    %c0_11 = arith.constant 0 : index
    %8 = vector.load %arg3[%c1_9, %c0_10, %c0_11] : memref<3x128x128xbf16, #tpu.memory_space<vmem>>, vector<1x128x128xbf16>
    %9 = vector.shape_cast %8 : vector<1x128x128xbf16> to vector<128x128xbf16>
    %cst_12 = arith.constant dense<0.000000e+00> : vector<16x128xf32>
    %10 = tpu.matmul %7, %9, %cst_12 {dimension_numbers = #tpu.dot_dimension_numbers<[1], [0], [0], [1], [0, 0, 1, 1], [], []>} : vector<16x128xbf16>, vector<128x128xbf16>, vector<16x128xf32> -> vector<16x128xf32>
    %c0_13 = arith.constant 0 : index
    %c0_14 = arith.constant 0 : index
    %11 = vector.load %arg7[%c0_13, %c0_14] : memref<16x128xf32, #tpu.memory_space<vmem>>, vector<16x128xf32>
    %12 = arith.addf %11, %10 : vector<16x128xf32>
    %c0_15 = arith.constant 0 : index
    %c0_16 = arith.constant 0 : index
    %13 = vector.load %arg7[%c0_15, %c0_16] : memref<16x128xf32, #tpu.memory_space<vmem>>, vector<16x128xf32>
    tpu.vector_store %arg7[%c0_15, %c0_16], %12 {strides = array<i32>} : memref<16x128xf32, #tpu.memory_space<vmem>>, vector<16x128xf32>,
    %c0_17 = arith.constant 0 : index
    %c2 = arith.constant 2 : index
    %c0_18 = arith.constant 0 : index
    %14 = vector.load %arg2[%c0_17, %c2, %c0_18] : memref<1x18x128xbf16, #tpu.memory_space<vmem>>, vector<1x16x128xbf16>
    %15 = vector.shape_cast %14 : vector<1x16x128xbf16> to vector<16x128xbf16>
    %c2_19 = arith.constant 2 : index
    %c0_20 = arith.constant 0 : index
    %c0_21 = arith.constant 0 : index
    %16 = vector.load %arg3[%c2_19, %c0_20, %c0_21] : memref<3x128x128xbf16, #tpu.memory_space<vmem>>, vector<1x128x128xbf16>
    %17 = vector.shape_cast %16 : vector<1x128x128xbf16> to vector<128x128xbf16>
    %cst_22 = arith.constant dense<0.000000e+00> : vector<16x128xf32>
    %18 = tpu.matmul %15, %17, %cst_22 {dimension_numbers = #tpu.dot_dimension_numbers<[1], [0], [0], [1], [0, 0, 1, 1], [], []>} : vector<16x128xbf16>, vector<128x128xbf16>, vector<16x128xf32> -> vector<16x128xf32>
    %c0_23 = arith.constant 0 : index
    %c0_24 = arith.constant 0 : index
    %19 = vector.load %arg7[%c0_23, %c0_24] : memref<16x128xf32, #tpu.memory_space<vmem>>, vector<16x128xf32>
    %20 = arith.addf %19, %18 : vector<16x128xf32>
    %c0_25 = arith.constant 0 : index
    %c0_26 = arith.constant 0 : index
    %21 = vector.load %arg7[%c0_25, %c0_26] : memref<16x128xf32, #tpu.memory_space<vmem>>, vector<16x128xf32>
    tpu.vector_store %arg7[%c0_25, %c0_26], %20 {strides = array<i32>} : memref<16x128xf32, #tpu.memory_space<vmem>>, vector<16x128xf32>,
    %c0_27 = arith.constant 0 : index
    %c0_28 = arith.constant 0 : index
    %22 = vector.load %arg7[%c0_27, %c0_28] : memref<16x128xf32, #tpu.memory_space<vmem>>, vector<16x128xf32>
    %c0_29 = arith.constant 0 : index
    %c0_30 = arith.constant 0 : index
    %23 = vector.load %arg4[%c0_29, %c0_30] : memref<1x128xf32, #tpu.memory_space<vmem>>, vector<1x128xf32>
    %24 = vector.broadcast %23 : vector<1x128xf32> to vector<16x128xf32>
    %25 = arith.mulf %22, %24 : vector<16x128xf32>
    %c0_31 = arith.constant 0 : index
    %c0_32 = arith.constant 0 : index
    %26 = vector.load %arg5[%c0_31, %c0_32] : memref<1x128xf32, #tpu.memory_space<vmem>>, vector<1x128xf32>
    %27 = vector.broadcast %26 : vector<1x128xf32> to vector<16x128xf32>
    %28 = arith.addf %25, %27 : vector<16x128xf32>
    %cst_33 = arith.constant 1.000000e-01 : f32
    %29 = vector.broadcast %cst_33 : f32 to vector<16x128xf32>
    %30 = arith.mulf %29, %28 : vector<16x128xf32>
    %31 = arith.maximumf %28, %30 : vector<16x128xf32>
    %32 = vector.shape_cast %31 : vector<16x128xf32> to vector<1x16x128xf32>
    %33 = arith.truncf %32 : vector<1x16x128xf32> to vector<1x16x128xbf16>
    %c0_34 = arith.constant 0 : index
    %c0_35 = arith.constant 0 : index
    %c0_36 = arith.constant 0 : index
    %34 = vector.load %arg6[%c0_34, %c0_35, %c0_36] : memref<1x16x128xbf16, #tpu.memory_space<vmem>>, vector<1x16x128xbf16>
    tpu.vector_store %arg6[%c0_34, %c0_35, %c0_36], %33 {strides = array<i32>} : memref<1x16x128xbf16, #tpu.memory_space<vmem>>, vector<1x16x128xbf16>,
    return
  }
  func.func @transform_0(%arg0: i32, %arg1: i32) -> (i32, i32, i32) {
    %c0_i32 = arith.constant 0 : i32
    %c0_i32_0 = arith.constant 0 : i32
    %c0_i32_1 = arith.constant 0 : i32
    return %arg0, %c0_i32, %c0_i32_0 : i32, i32, i32
  }
  func.func @transform_1(%arg0: i32, %arg1: i32) -> (i32, i32, i32) {
    %c0_i32 = arith.constant 0 : i32
    %c0_i32_0 = arith.constant 0 : i32
    %c0_i32_1 = arith.constant 0 : i32
    %c0_i32_2 = arith.constant 0 : i32
    return %c0_i32, %c0_i32_0, %c0_i32_1 : i32, i32, i32
  }
  func.func @transform_2(%arg0: i32, %arg1: i32) -> (i32, i32) {
    %c0_i32 = arith.constant 0 : i32
    %c0_i32_0 = arith.constant 0 : i32
    %c0_i32_1 = arith.constant 0 : i32
    return %c0_i32, %c0_i32_0 : i32, i32
  }
  func.func @transform_3(%arg0: i32, %arg1: i32) -> (i32, i32) {
    %c0_i32 = arith.constant 0 : i32
    %c0_i32_0 = arith.constant 0 : i32
    %c0_i32_1 = arith.constant 0 : i32
    return %c0_i32, %c0_i32_0 : i32, i32
  }
  func.func @transform_4(%arg0: i32, %arg1: i32) -> (i32, i32, i32) {
    %c0_i32 = arith.constant 0 : i32
    %c0_i32_0 = arith.constant 0 : i32
    return %arg0, %arg1, %c0_i32 : i32, i32, i32
  }
}

</mosaic_0001>

<bundles_post_ra>
// kernel: tpu_custom_call.1
= control target key start
LH: loop header
LB: loop body
LE: loop exit
PB: predicated region body
PF: predicated region fallthrough
CT: control target
= control target key end

     0   :  { %9 = vsyncpa [#allocation4], 0  ;;  %s1333_s0 = inlined_call_operand.vmem [shape: bf16[2,18,128], index: 0, kind: input, shape index: {}]   ;;  %s1334_s1 = inlined_call_operand.hbm [shape: bf16[3,128,128], index: 1, kind: input, shape index: {}]   ;;  %s1335_s2 = inlined_call_operand.vmem [shape: f32[1,128], index: 2, kind: input, shape index: {}]   ;;  %s1336_s3 = inlined_call_operand.vmem [shape: f32[1,128], index: 3, kind: input, shape index: {}]   ;;  %s1337_s4 = inlined_call_operand.hbm [shape: bf16[2,16,128], index: 4, kind: output, shape index: {}]  }
   0x1   :  { %10 = vsyncpa [#allocation5], 0 }
   0x2   :  { %12 = vsyncpa [#allocation5 + $0x1], 0  ;;  %s1137_s15 = smov 0   ;;  %s1139_s16 = smov 0  }
   0x3   :  { %s1141_s17 = smov 0   ;;  %s1143_s18 = smov 0  }
   0x4   :  { %s1145_s19 = smov 0   ;;  %s1147_s20 = smov 0  }
   0x5 LB: > { %s742_s21 = sadd.s32 4294967295, %s1102_s20   ;;  %s743_s22 = sadd.s32 4294967294, %s1102_s20   ;;  %s1102_s20 = sphi %s1147_s20, %s18_s20   ;;  %s1098_s19 = sphi %s1145_s19, %s1355_s19   ;;  %s1094_s18 = sphi %s1143_s18, %s1354_s18   ;;  %s1090_s17 = sphi %s1141_s17, %s1353_s17   ;;  %s1086_s16 = sphi %s1139_s16, %s1352_s16   ;;  %s1082_s15 = sphi %s1137_s15, %s1351_s15  }
   0x6   : > { %s30_s23 = sadd.s32 1, %s1098_s19  ;;  %s128_s24 = sadd.s32 1, %s1090_s17 }
   0x7   : > { %p32_p0 = scmp.ge.s32.totalorder %s30_s23, 2  ;;  %p138_p1 = scmp.ne.s32.totalorder %s1090_s17, %s1086_s16 }
   0x8   : > { %p139_p2 = scmp.eq.s32.totalorder %s742_s21, 1  ;;  %p144_p3 = scmp.ne.s32.totalorder %s1086_s16, %s1082_s15 }
   0x9   : > { %s1357_s23 = smov (%p32_p0, %s30_s23), 0  ;;  %p145_p5 = scmp.eq.s32.totalorder %s743_s22, 1 }
   0xa   : > { %p1177_p4 = por %p139_p2, %p138_p1  ;;  %s123_s26 = ssub.s32 %s1098_s19, %s1357_s23 }
   0xb   : > { %p744_p6 = scmp.ge.s32.totalorder %s1102_s20, 1  ;;  %p126_p7 = scmp.eq.s32.totalorder %s123_s26, 0 }
   0xc   : > { %s1342_s25 = scalar_select %p1177_p4, 1, 0 }
   0xd   : > { %p1184_p8 = por %p145_p5, %p144_p3  ;;  %p152_p9 = scmp.lt.s32.totalorder %s1102_s20, 3 }
   0xe   : > { %s1190_s28 = scalar_select %p126_p7, %s1090_s17, %s128_s24  }
   0xf   : > { %s1343_s27 = scalar_select %p1184_p8, 1, 0 }
  0x10   : > { %p1192_p10 = pnand %p744_p6, %p152_p9  ;;  %p1196_p11 = scmp.eq.s32.totalorder %s742_s21, 0 }
  0x11   : > { %s1104_s5 = smov [#allocation3]   ;;  %s992_s10 = scalar_lea.hbm %s1334_s1, 3072 }
  0x12   : > { %s1344_s29 = scalar_select %p1192_p10, 1, 0 }
  0x13   : > { %s1345_s30 = scalar_select %p1196_p11, 1, 0 }
  0x14   : > { %p897_p12 = pneg %p1192_p10  ;;  %s164_s6 = sshll.u32 %s1104_s5, 4  ;;  %s165_s6 = int_to_ptr.vmem [resolvable:$true] %s164_s6 }
  0x15   : > { %p993_p0 = scmp.ne.s32.totalorder %s1334_s1, %s992_s10  ;;  %p999_p5 = scmp.lt.u32.totalorder %s992_s10, %s1334_s1 }
  0x16   : > { %p1204_p13 = pnand %p1196_p11, %p897_p12 }
  0x18   : > { %p994_p1 = pneg %p1204_p13 }
  0x1a   : > { %p995_p2 = pnand %p994_p1, %p993_p0 }
  0x1c   : > { %p996_p3 = pneg %p995_p2 }
  0x1e   : > { %p1001_p6 = pnand %p999_p5, %p996_p3 }
  0x20   : > { %1004 = shalt.err (!%p1001_p6)
}
  0x21   : > { %s1005_s21 = scalar_lea.vmem %s165_s6, 3072  ;;  %p1013_p8 = scmp.lt.s32.totalorder %s165_s6, %s165_s6 }
  0x22   : > { %p1006_p7 = scmp.ne.s32.totalorder %s165_s6, %s1005_s21  ;;  %p1014_p4 = scmp.lt.s32.totalorder %s1005_s21, %s1005_s21 }
  0x24   : > { %p1008_p9 = pnand %p1006_p7, %p994_p1  ;;  %p1015_p11 = por %p1014_p4, %p1013_p8 }
  0x26   : > { %p1009_p12 = pneg %p1008_p9 }
  0x28   : > { %p1016_p10 = pnand %p1015_p11, %p1009_p12 }
  0x2a   : > { %1019 = shalt.err (!%p1016_p10)
}
  0x2b   : > { %s1105_s22 = smov 64   ;;  %s1106_s24 = smov 4  }
  0x2c   : > { %900 = dma.hbm_to_vmem [thread:$0]  (!%p1204_p13), %s1334_s1, 3072, %s165_s6, [#allocation4], %s1105_s22, %s1105_s22, %s1106_s24  }
  0x2d   : > { %p1347_p0 = scmp.ne.s32.totalorder %s1344_s29, 0 }
  0x2e   : > { %p1348_p2 = scmp.ne.s32.totalorder (!%p1347_p0), %s1345_s30, 0 }
  0x2f   : > { %194 = sbr.rel (%p1347_p0) target bundleno = 362 (0x16a), region = 36 }
  0x36   : > { %1073 = dma.done.wait (%p1348_p2), [#allocation4], 3072  }
  0x37   : > { %1075 = vsyncadd (%p1348_p2), [#allocation4], 4294964224  ;;  %v1107_v0 = vmov 0.0   ;;  %vm1108_vm0 = vmmov 0   ;;  %p220_p4 = scmp.lt.s32.totalorder %s1094_s18, 1  ;;  %v963_v1 = vld [vmem:[#allocation3 + $0x40] sm:$0xff]  }
  0x38   : > { %844 = vmatprep.subr.bf16.mxu0 %v1107_v0  ;;  %824 = vmatprep.subr.bf16.mxu1 %v1107_v0  ;;  %v964_v2 = vld [vmem:[#allocation3 + $0x48] sm:$0xff]   ;;  %v965_v3 = vld [vmem:[#allocation3 + $0x50] sm:$0xff]   ;;  %v971_v4 = vld [vmem:[#allocation3] sm:$0xff]   ;;  %vm370_vm1 = vsmask.f32 7424  ;;  %vm507_vm2 = vcmask 1046528  }
  0x39   : > { %860 = vmatprep.mubr.msk.bf16.mxu0 %vm1108_vm0, %v1107_v0  ;;  %840 = vmatprep.mubr.msk.bf16.mxu1 %vm1108_vm0, %v1107_v0  ;;  %s221_s29 = scalar_select %p220_p4, %s1094_s18, 1  ;;  %v966_v5 = vld [vmem:[#allocation3 + $0x58] sm:$0xff]   ;;  %v975_v6 = vld [vmem:[#allocation3 + $0x8] sm:$0xff]   ;;  %v967_v7 = vld [vmem:[#allocation3 + $0x60] sm:$0xff]  }
  0x3a   : > { %845 = vmatpush3.bf16.msra.mxu0 %v963_v1  ;;  %825 = vmatpush3.bf16.msra.mxu1 %v971_v4  ;;  %v977_v10 = vld [vmem:[#allocation3 + $0x10] sm:$0xff]   ;;  %v968_v11 = vld [vmem:[#allocation3 + $0x68] sm:$0xff]   ;;  %v979_v13 = vld [vmem:[#allocation3 + $0x18] sm:$0xff]   ;;  %s217_s11 = sand.u32 1, %s1086_s16   ;;  %s791_s21 = sshll.u32 %s1094_s18, 7 }
  0x3b   : > { %846 = vmatprep.subr.bf16.mxu0 %v1107_v0  ;;  %s890_s30 = smul.u32 12, %s221_s29  ;;  %826 = vmatprep.subr.bf16.mxu1 %v1107_v0  ;;  %v969_v14 = vld [vmem:[#allocation3 + $0x70] sm:$0xff]   ;;  %v981_v18 = vld [vmem:[#allocation3 + $0x20] sm:$0xff]   ;;  %v970_v19 = vld [vmem:[#allocation3 + $0x78] sm:$0xff]   ;;  %s749_s14 = sshll.u32 %s217_s11, 3 }
  0x3c   : > { %v983_v22 = vld [vmem:[#allocation3 + $0x28] sm:$0xff]   ;;  %v974_v24 = vld [vmem:[#allocation3 + $0x80] sm:$0xff]   ;;  %v985_v25 = vld [vmem:[#allocation3 + $0x30] sm:$0xff]   ;;  %s219_s22 = scalar_lea.vmem [#allocation6], %s749_s14  ;;  %s1283_s29 = scalar_lea.hbm %s1337_s4, %s791_s21 }
  0x3d   : > { %s1243_s8 = scalar_lea.vmem %s1333_s0, %s890_s30  ;;  %v976_v26 = vld [vmem:[#allocation3 + $0x88] sm:$0xff]   ;;  %v987_v27 = vld [vmem:[#allocation3 + $0x38] sm:$0xff]   ;;  %v978_v29 = vld [vmem:[#allocation3 + $0x90] sm:$0xff]   ;;  %s657_s24 = sshll.u32 %s219_s22, 4  ;;  %s1285_s24 = int_to_ptr.vmem [resolvable:$true] %s657_s24 }
  0x3e   : > { %847 = vmatpush3.bf16.msra.mxu0 %v964_v2  ;;  %v972_v8 = vld [vmem:[%s1243_s8] sm:$0xff]   ;;  %827 = vmatpush3.bf16.msra.mxu1 %v975_v6  ;;  %v973_v9 = vld [vmem:[%s1243_s8 + $0x8] ss:$0 sps:$4 sm:$0x11]   ;;  %v980_v30 = vld [vmem:[#allocation3 + $0x98] sm:$0xff]   ;;  %s1287_s30 = scalar_lea.sflag [#allocation5], %s217_s11 }
  0x3f   : > { %848 = vmatprep.subr.bf16.mxu0 %v1107_v0  ;;  %828 = vmatprep.subr.bf16.mxu1 %v1107_v0  ;;  %v374_v12 = vshll.u32 %v972_v8, 16  ;;  %v372_v15 = vshrl.u32 %v972_v8, 16  ;;  %v379_v16 = vshll.u32 %v973_v9, 16  ;;  %v988_v28 = vld [vmem:[%s1243_s8] sm:$0xff]   ;;  %v982_v31 = vld [vmem:[#allocation3 + $0xa0] sm:$0xff]   ;;  %v986_v33 = vld [vmem:[#allocation3 + $0xb0] sm:$0xff]  }
  0x40   : > { %v984_v32 = vld [vmem:[#allocation3 + $0xa8] sm:$0xff]   ;;  %v991_v35 = vld [vmem:[%s1243_s8 + $0x8] ss:$0 sps:$4 sm:$0x11]   ;;  %v989_v36 = vld [vmem:[#allocation3 + $0xb8] sm:$0xff]   ;;  %s1020_s6 = scalar_lea.vmem %s1285_s24, 128 }
  0x41   : > { %v376_v17 = vrot.slane %v374_v12, 1  ;;  %v381_v21 = vrot.slane %v379_v16, 1  ;;  %v990_v34 = vld [vmem:[%s1243_s8] sm:$0xfe]   ;;  %v509_v38 = vrot.slane %v991_v35, 1  ;;  %p1021_p8 = scmp.ne.s32.totalorder %s1285_s24, %s1020_s6  ;;  %p1349_p10 = scmp.ne.s32.totalorder %s1342_s25, 0 }
  0x42   : > { %849 = vmatpush3.bf16.msra.mxu0 %v965_v3  ;;  %829 = vmatpush3.bf16.msra.mxu1 %v977_v10  ;;  %v508_v37 = vrot.slane %v990_v34, 1  ;;  %v780_v45 = vld [vmem:[%s1335_s2] ss:$0 sm:$0xff]  ;;  %s1109_s18 = smov [#allocation6]  }
  0x43   : > { %850 = vmatprep.subr.bf16.mxu0 %v1107_v0  ;;  %830 = vmatprep.subr.bf16.mxu1 %v1107_v0  ;;  %v377_v20 = vor.u32 %v376_v17, %v372_v15  ;;  %v781_v48 = vld [vmem:[%s1336_s3] ss:$0 sm:$0xff]  ;;  %p1022_p11 = pnand %p1021_p8, %p1349_p10  ;;  %s1024_s7 = sshll.u32 %s1109_s18, 4  ;;  %s1025_s7 = int_to_ptr.vmem [resolvable:$false] %s1024_s7 }
  0x44   : > { %v510_v39 = vsel %vm507_vm2, %v508_v37, %v509_v38  ;;  %s1026_s8 = scalar_lea.vmem %s1025_s7, 256  ;;  %p1027_p1 = scmp.lt.s32.totalorder %s1285_s24, %s1025_s7 }
  0x45   : > { %v382_v23 = vsel %vm370_vm1, %v377_v20, %v381_v21  ;;  %p1023_p13 = pneg %p1022_p11  ;;  %p1028_p3 = scmp.lt.s32.totalorder %s1026_s8, %s1020_s6 }
  0x46   : > { %851 = vmatpush3.bf16.msra.mxu0 %v966_v5  ;;  %831 = vmatpush3.bf16.msra.mxu1 %v979_v13 }
  0x47   : > { %852 = vmatprep.subr.bf16.mxu0 %v1107_v0  ;;  %832 = vmatprep.subr.bf16.mxu1 %v1107_v0  ;;  %p1029_p5 = por %p1028_p3, %p1027_p1 }
  0x49   : > { %p1030_p6 = pnand %p1029_p5, %p1023_p13 }
  0x4a   : > { %853 = vmatpush3.bf16.msra.mxu0 %v967_v7  ;;  %833 = vmatpush3.bf16.msra.mxu1 %v981_v18 }
  0x4b   : > { %854 = vmatprep.subr.bf16.mxu0 %v1107_v0  ;;  %834 = vmatprep.subr.bf16.mxu1 %v1107_v0 }
  0x4e   : > { %855 = vmatpush3.bf16.msra.mxu0 %v968_v11  ;;  %835 = vmatpush3.bf16.msra.mxu1 %v983_v22 }
  0x4f   : > { %856 = vmatprep.subr.bf16.mxu0 %v1107_v0  ;;  %836 = vmatprep.subr.bf16.mxu1 %v1107_v0 }
  0x52   : > { %857 = vmatpush3.bf16.msra.mxu0 %v969_v14  ;;  %837 = vmatpush3.bf16.msra.mxu1 %v985_v25 }
  0x53   : > { %858 = vmatprep.subr.bf16.mxu0 %v1107_v0  ;;  %838 = vmatprep.subr.bf16.mxu1 %v1107_v0 }
  0x56   : > { %859 = vmatpush3.bf16.msra.mxu0 %v970_v19  ;;  %839 = vmatpush3.bf16.msra.mxu1 %v987_v27 }
  0x57   : > { %864 = vmatprep.subr.bf16.mxu0 %v1107_v0 }
  0x59   : > { %861 = vmatmul.mubr.bf16.vlgmr.msra.gmra.mrb[0].mxu0 %v382_v23  ;;  %841 = vmatmul.mubr.bf16.vlgmr.msra.gmra.mrb[0].mxu1 %v988_v28 }
  0x5a   : > { %865 = vmatpush3.bf16.msra.mxu0 %v974_v24  ;;  %880 = vmatprep.mubr.msk.bf16.mxu0 %vm1108_vm0, %v1107_v0 }
  0x5b   : > { %866 = vmatprep.subr.bf16.mxu0 %v1107_v0 }
  0x5e   : > { %867 = vmatpush3.bf16.msra.mxu0 %v976_v26 }
  0x5f   : > { %868 = vmatprep.subr.bf16.mxu0 %v1107_v0 }
  0x62   : > { %869 = vmatpush3.bf16.msra.mxu0 %v978_v29 }
  0x63   : > { %870 = vmatprep.subr.bf16.mxu0 %v1107_v0 }
  0x66   : > { %871 = vmatpush3.bf16.msra.mxu0 %v980_v30 }
  0x67   : > { %872 = vmatprep.subr.bf16.mxu0 %v1107_v0 }
  0x6a   : > { %873 = vmatpush3.bf16.msra.mxu0 %v982_v31 }
  0x6b   : > { %874 = vmatprep.subr.bf16.mxu0 %v1107_v0 }
  0x6e   : > { %875 = vmatpush3.bf16.msra.mxu0 %v984_v32 }
  0x6f   : > { %876 = vmatprep.subr.bf16.mxu0 %v1107_v0 }
  0x72   : > { %877 = vmatpush3.bf16.msra.mxu0 %v986_v33 }
  0x73   : > { %878 = vmatprep.subr.bf16.mxu0 %v1107_v0 }
  0x76   : > { %879 = vmatpush3.bf16.msra.mxu0 %v989_v36 }
  0x79   : > { %881 = vmatmul.mubr.bf16.vlgmr.msra.gmra.mrb[0].mxu0 %v510_v39 }
 0x12c   : > { %v333_v40 = vpop.f32.mrb[0].mxu1 }
 0x12d   : > { %v842_v41 = vpop.f32.mrb[1].mxu1 }
 0x12e   : > { %v336_v42 = vpop.f32.mrb[2].mxu1 }
 0x12f   : > { %v843_v43 = vpop.f32.mrb[3].mxu1 }
 0x14c   : > { %v594_v44 = vpop.f32.mrb[0].mxu0 }
 0x14d   : > { %v884_v46 = vadd.f32 %v594_v44, %v333_v40  ;;  %v882_v47 = vpop.f32.mrb[1].mxu0 }
 0x14e   : > { %v597_v49 = vpop.f32.mrb[2].mxu0 }
 0x14f   : > { %v616_v50 = vmul.f32 %v884_v46, %v780_v45  ;;  %v885_v51 = vadd.f32 %v597_v49, %v336_v42  ;;  %v883_v52 = vpop.f32.mrb[3].mxu0 }
 0x151   : > { %v625_v53 = vadd.f32 %v781_v48, %v616_v50  ;;  %v617_v54 = vmul.f32 %v885_v51, %v780_v45 }
 0x153   : > { %v627_v55 = vmul.f32 0.1, %v625_v53  ;;  %v626_v56 = vadd.f32 %v781_v48, %v617_v54 }
 0x155   : > { %v628_v57 = vmul.f32 0.1, %v626_v56  ;;  %v629_v58 = vmax.f32 %v625_v53, %v627_v55 }
 0x157   : > { %v630_v59 = vmax.f32 %v626_v56, %v628_v57 }
 0x159   : > { %v795_v60 = vpack.c.bf16 %v630_v59, %v629_v58 }
 0x15b   : > { %796 = vst [vmem:[%s219_s22] sm:$0xff] %v795_v60  }
 0x15c   : > { %1033 = shalt.err (!%p1030_p6)
}
 0x15d   : > { %s1034_s9 = scalar_lea.hbm %s1283_s29, 128  ;;  %s1038_s12 = scalar_lea.hbm %s1337_s4, 256 }
 0x15e   : > { %p1035_p7 = scmp.ne.s32.totalorder %s1283_s29, %s1034_s9  ;;  %p1039_p0 = scmp.lt.u32.totalorder %s1283_s29, %s1337_s4 }
 0x15f   : > { %p1040_p2 = scmp.lt.u32.totalorder %s1038_s12, %s1034_s9  ;;  %p1042_p8 = scmp.lt.u32.totalorder %s1034_s9, %s1283_s29 }
 0x160   : > { %p1036_p9 = pnand %p1035_p7, %p1349_p10 }
 0x161   : > { %p1041_p4 = por %p1040_p2, %p1039_p0 }
 0x162   : > { %p1037_p12 = pneg %p1036_p9 }
 0x163   : > { %p1043_p11 = por %p1042_p8, %p1041_p4 }
 0x165   : > { %p1044_p13 = pnand %p1043_p11, %p1037_p12 }
 0x167   : > { %1047 = shalt.err (!%p1044_p13)
}
 0x168   : > { %s1110_s21 = smov 64   ;;  %s1111_s22 = smov 4  }
 0x169   : > { %895 = dma.vmem_to_hbm [thread:$0]  (%p1349_p10), %s1285_s24, 128, %s1283_s29, %s1287_s30, %s1110_s21, %s1110_s21, %s1111_s22  }
 0x16a PF: > { %p907_p1 = scmp.ge.s32.totalorder %s1102_s20, 2  ;;  %s672_s26 = sand.u32 1, %s1082_s15  }
 0x16b   : > { %p1350_p3 = scmp.ne.s32.totalorder %s1343_s27, 0  ;;  %s673_s5 = scalar_lea.sflag [#allocation5], %s672_s26 }
 0x16d   : > { %p902_p5 = pnand %p907_p1, %p1350_p3 }
 0x16f   : > { %1077 = dma.done.wait (!%p902_p5), %s673_s5, 128  }
 0x170   : > { %1079 = vsyncadd (!%p902_p5), %s673_s5, 4294967168  ;;  %s18_s20 = sadd.s32 1, %s1102_s20   ;;  %s1351_s15 = smov %s1086_s16 }
 0x171   : > { %p15_p6 = scmp.ge.s32.totalorder %s18_s20, 4   ;;  %s1352_s16 = smov %s1090_s17 }
 0x172   : > { %s1353_s17 = smov %s1190_s28  ;;  %s1354_s18 = smov %s1098_s19 }
 0x173   : > { %s1355_s19 = smov %s1357_s23  ;;  %17 = sbr.rel (!%p15_p6) target bundleno = 5 (0x5), region = 78 }
 0x17a   :  { %678 = vsyncpa [#allocation4], 1 }
 0x17b   :  { %680 = vsyncpa [#allocation4 + $0x1], 1 }
 0x17c   :  { %681 = vsyncpa [#allocation5], 1 }
 0x17d   :  { %683 = vsyncpa [#allocation5 + $0x1], 1 }

</bundles_post_ra>
